<compile_context>
chip_gen: v7x
topology: tpu7x:2x2x1
jax: 0.10.0
libtpu: 0.0.40
codegen_flags: <defaults>
</compile_context>

<pallas_src>
import functools

import jax
import jax.numpy as jnp
from jax.experimental import pallas as pl
from jax.experimental.pallas import tpu as pltpu

_LANE = 128
_MAX_FEATURE_TILE = 2048               # lanes per feature block (multiple of 128)
_TARGET_INPUT_BYTES = 8 * 1024 * 1024  # aim ~8 MiB per buffered input block


def _round_up(x, m):
    return ((x + m - 1) // m) * m


def _vmem_budget_bytes():
    """Returns (tile-sizing budget, vmem_limit_bytes) -- TPU-generation aware."""
    try:
        phys = int(getattr(pltpu.get_tpu_info(), "vmem_capacity_bytes", 0))
    except Exception:
        phys = 0
    if phys >= 100 * 1024 * 1024:                 # v5e / v6e: 128 MiB physical VMEM
        return 48 * 1024 * 1024, 64 * 1024 * 1024
    # v7x (64 MiB physical) or unknown generation: stay conservative.
    return 32 * 1024 * 1024, 48 * 1024 * 1024


def _choose_tiles(B, N, budget_bytes, batch_tile=None, feature_tile=None):
    """Pick (batch_tile, feature_tile) from a lane-padding-aware byte budget."""
    # Feature tile: take the whole feature dim unless it is very wide; then
    # block it in 128-lane multiples (the ragged tail is masked in-kernel).
    if feature_tile is None:
        tk = N if N <= _MAX_FEATURE_TILE else _MAX_FEATURE_TILE
    else:
        tk = max(1, min(int(feature_tile), N))
        if tk < N:
            tk = (tk // _LANE) * _LANE            # interior blocks stay lane aligned
            if tk == 0:
                tk = N
    tk_pad = _round_up(tk, _LANE)                 # real (lane-padded) VMEM width

    # Batch tile: ~8 MiB of padded input per buffer, clamped by the budget.
    # Per-row VMEM: 2 double-buffered input blocks + ~2 elementwise temporaries
    # (masked x, x*w) + reduce/output slivers.
    per_row_bytes = 4 * tk_pad * 4 + 640
    if batch_tile is None:
        tb = min(_TARGET_INPUT_BYTES // (tk_pad * 4),
                 budget_bytes // per_row_bytes)
    else:
        tb = max(1, int(batch_tile))
    if tb >= B:
        tb = B                                    # single full block (exempt from 8x128 rule)
    else:
        tb = max(_LANE, (tb // _LANE) * _LANE)    # keep (1, tb) output blocks lane-dense
    return tb, tk


def _linreg_kernel(x_ref, w_ref, b_ref, o_ref, *, n_features, feature_tile):
    # x_ref: (tb, tk) f32 VMEM   batch tile x feature block (streamed)
    # w_ref: (1, tk)  f32 VMEM   weight block, PyTorch (out=1, in=N) layout
    # b_ref: (1,)     f32 SMEM   scalar bias
    # o_ref: (1, tb)  f32 VMEM   lane-dense output tile, resident across k
    k = pl.program_id(1)

    x = x_ref[...]
    w = w_ref[...]
    if n_features % feature_tile:   # static: only a ragged last feature block pays this
        valid = (jax.lax.broadcasted_iota(jnp.int32, (1, feature_tile), 1)
                 + k * feature_tile) < n_features
        x = jnp.where(valid, x, 0.0)   # zero both operands so stale-VMEM NaNs
        w = jnp.where(valid, w, 0.0)   # cannot reach valid rows via NaN * 0

    # Exact-f32 VPU broadcast multiply + per-row reduce, repacked lane-dense.
    part = jnp.sum(x * w, axis=-1)[None, :]                  # (1, tb)

    @pl.when(k == 0)
    def _init():
        o_ref[...] = part + b_ref[0]

    @pl.when(k > 0)
    def _accum():
        o_ref[...] += part


def linear_regression_forward(data, weight, bias, *, batch_tile=None,
                              feature_tile=None, force_pallas=False):
    """data: (B, N) f32; weight: (1, N) f32 (PyTorch layout); bias: (1,) f32."""
    data = jnp.asarray(data, jnp.float32)
    weight = jnp.asarray(weight, jnp.float32).reshape(1, -1)
    bias = jnp.asarray(bias, jnp.float32).reshape(1)
    B, N = data.shape

    # Review item: for N < 128 the in-kernel lane reduce runs at N/128 occupancy
    # and cannot reach the streaming roofline; one fused XLA mul+reduce is the
    # right production path for narrow feature dims.
    if not force_pallas and N < _LANE:
        return jnp.sum(data * weight, axis=-1, keepdims=True) + bias

    budget, vmem_limit = _vmem_budget_bytes()
    tb, tk = _choose_tiles(B, N, budget, batch_tile, feature_tile)
    nb = pl.cdiv(B, tb)   # ragged last batch tile: garbage rows -> dropped output lanes >= B
    nk = pl.cdiv(N, tk)   # ragged last feature block: masked in-kernel

    kernel = functools.partial(_linreg_kernel, n_features=N, feature_tile=tk)

    out_row = pl.pallas_call(
        kernel,
        out_shape=jax.ShapeDtypeStruct((1, B), jnp.float32),
        grid_spec=pltpu.PrefetchScalarGridSpec(
            num_scalar_prefetch=0,
            grid=(nb, nk),                                     # reduction axis innermost
            in_specs=[
                pl.BlockSpec((tb, tk), lambda i, k: (i, k)),   # streamed input tile
                pl.BlockSpec((1, tk), lambda i, k: (0, k)),    # small weight block
                pl.BlockSpec(memory_space=pltpu.MemorySpace.SMEM),   # scalar bias
            ],
            out_specs=pl.BlockSpec((1, tb), lambda i, k: (0, i)),    # lane-dense, resident over k
        ),
        compiler_params=pltpu.CompilerParams(
            # Independent batch tiles -> shardable across v7x's two TensorCores;
            # the feature axis carries the accumulation.
            dimension_semantics=("parallel", "arbitrary"),
            # Enlarged tiles exceed the default scoped VMEM limits (16 MiB on
            # v5e, 32 MiB on v6e/v7x), so raise the limit explicitly.
            vmem_limit_bytes=int(vmem_limit),
        ),
    )(data, weight, bias)

    # (1, B) lane-dense slab -> PyTorch (B, 1) prediction.
    return out_row.reshape(B, 1)


def _reference(data, weight, bias):
    # Exact-f32 reference (elementwise multiply + reduce): avoids any TPU
    # matmul default-precision ambiguity in the check itself.
    return jnp.sum(data * weight, axis=-1, keepdims=True) + bias


if __name__ == "__main__":
    key = jax.random.PRNGKey(0)
    k_w, k_b, k_x1, k_x2, k_x3 = jax.random.split(key, 5)

    # --- Small shapes consistent with the module: batch=8, input_nodes=32. ---
    batch, input_nodes = 8, 32
    bound = 1.0 / (input_nodes ** 0.5)            # nn.Linear default init range
    weight = jax.random.uniform(k_w, (1, input_nodes), jnp.float32, -bound, bound)
    bias = jax.random.uniform(k_b, (1,), jnp.float32, -bound, bound)
    data = jax.random.normal(k_x1, (batch, input_nodes), jnp.float32)

    out = jax.block_until_ready(
        linear_regression_forward(data, weight, bias, force_pallas=True))
    assert out.shape == (batch, 1)
    assert jnp.allclose(out, _reference(data, weight, bias), atol=1e-5, rtol=1e-5)

    # --- Ragged batch tiles (no wrapper pad), N >= 128 streaming path. ---
    b2, n2 = 1000, 256
    bound2 = 1.0 / (n2 ** 0.5)
    w2 = jax.random.uniform(k_w, (1, n2), jnp.float32, -bound2, bound2)
    d2 = jax.random.normal(k_x2, (b2, n2), jnp.float32)
    out2 = jax.block_until_ready(
        linear_regression_forward(d2, w2, bias, batch_tile=256))
    assert out2.shape == (b2, 1)
    assert jnp.allclose(out2, _reference(d2, w2, bias), atol=1e-4, rtol=1e-4)

    # --- Feature-blocked path: ragged last feature block + ragged batch tile. ---
    b3, n3 = 300, 2000
    bound3 = 1.0 / (n3 ** 0.5)
    w3 = jax.random.uniform(k_w, (1, n3), jnp.float32, -bound3, bound3)
    d3 = jax.random.normal(k_x3, (b3, n3), jnp.float32)
    out3 = jax.block_until_ready(
        linear_regression_forward(d3, w3, bias, batch_tile=128, feature_tile=512))
    assert out3.shape == (b3, 1)
    assert jnp.allclose(out3, _reference(d3, w3, bias), atol=1e-4, rtol=1e-4)

    print("KERNEL_OK")
</pallas_src>

<mosaic_0001>
module attributes {stable_mosaic.version = 11 : i64} {
  func.func @_linreg_kernel(%arg0: i32, %arg1: i32, %arg2: memref<8x32xf32, #tpu.memory_space<vmem>>, %arg3: memref<1x32xf32, #tpu.memory_space<vmem>>, %arg4: memref<1xf32, #tpu.memory_space<smem>>, %arg5: memref<1x8xf32, #tpu.memory_space<vmem>>) attributes {dimension_semantics = [#tpu.dimension_semantics<parallel>, #tpu.dimension_semantics<arbitrary>], iteration_bounds = array<i64: 1, 1>, scalar_prefetch = 0 : i64, scratch_operands = 0 : i64, tpu.core_type = #tpu.core_type<tc>, window_params = [{transform_indices = @transform_0, window_bounds = array<i64: 8, 32>}, {transform_indices = @transform_1, window_bounds = array<i64: 1, 32>}, {transform_indices = @transform_2, window_bounds = array<i64: 1>}, {transform_indices = @transform_3, window_bounds = array<i64: 1, 8>}]} {
    %c0 = arith.constant 0 : index
    %c0_0 = arith.constant 0 : index
    %0 = vector.load %arg2[%c0, %c0_0] : memref<8x32xf32, #tpu.memory_space<vmem>>, vector<8x32xf32>
    %c0_1 = arith.constant 0 : index
    %c0_2 = arith.constant 0 : index
    %1 = vector.load %arg3[%c0_1, %c0_2] : memref<1x32xf32, #tpu.memory_space<vmem>>, vector<1x32xf32>
    %2 = vector.broadcast %1 : vector<1x32xf32> to vector<8x32xf32>
    %3 = arith.mulf %0, %2 : vector<8x32xf32>
    %cst = arith.constant dense<0.000000e+00> : vector<8xf32>
    %4 = vector.multi_reduction <add>, %3, %cst [1] : vector<8x32xf32> to vector<8xf32>
    %5 = vector.shape_cast %4 : vector<8xf32> to vector<1x8xf32>
    %c0_i32 = arith.constant 0 : i32
    %6 = arith.cmpi eq, %arg1, %c0_i32 : i32
    %7 = arith.extui %6 : i1 to i32
    %c0_i32_3 = arith.constant 0 : i32
    %8 = arith.cmpi ne, %7, %c0_i32_3 : i32
    scf.if %8 {
      %c0_6 = arith.constant 0 : index
      %12 = memref.load %arg4[%c0_6] : memref<1xf32, #tpu.memory_space<smem>>
      %13 = vector.broadcast %12 : f32 to vector<1x8xf32>
      %14 = arith.addf %5, %13 : vector<1x8xf32>
      %c0_7 = arith.constant 0 : index
      %c0_8 = arith.constant 0 : index
      %15 = vector.load %arg5[%c0_7, %c0_8] : memref<1x8xf32, #tpu.memory_space<vmem>>, vector<1x8xf32>
      tpu.vector_store %arg5[%c0_7, %c0_8], %14 {strides = array<i32>} : memref<1x8xf32, #tpu.memory_space<vmem>>, vector<1x8xf32>,
    } else {
    }
    %c0_i32_4 = arith.constant 0 : i32
    %9 = arith.cmpi sgt, %arg1, %c0_i32_4 : i32
    %10 = arith.extui %9 : i1 to i32
    %c0_i32_5 = arith.constant 0 : i32
    %11 = arith.cmpi ne, %10, %c0_i32_5 : i32
    scf.if %11 {
      %c0_6 = arith.constant 0 : index
      %c0_7 = arith.constant 0 : index
      %12 = vector.load %arg5[%c0_6, %c0_7] : memref<1x8xf32, #tpu.memory_space<vmem>>, vector<1x8xf32>
      %13 = arith.addf %12, %5 : vector<1x8xf32>
      %c0_8 = arith.constant 0 : index
      %c0_9 = arith.constant 0 : index
      %14 = vector.load %arg5[%c0_8, %c0_9] : memref<1x8xf32, #tpu.memory_space<vmem>>, vector<1x8xf32>
      tpu.vector_store %arg5[%c0_8, %c0_9], %13 {strides = array<i32>} : memref<1x8xf32, #tpu.memory_space<vmem>>, vector<1x8xf32>,
    } else {
    }
    return
  }
  func.func @transform_0(%arg0: i32, %arg1: i32) -> (i32, i32) {
    %c0_i32 = arith.constant 0 : i32
    return %arg0, %arg1 : i32, i32
  }
  func.func @transform_1(%arg0: i32, %arg1: i32) -> (i32, i32) {
    %c0_i32 = arith.constant 0 : i32
    %c0_i32_0 = arith.constant 0 : i32
    return %c0_i32, %arg1 : i32, i32
  }
  func.func @transform_2(%arg0: i32, %arg1: i32) -> i32 {
    %c0_i32 = arith.constant 0 : i32
    %c0_i32_0 = arith.constant 0 : i32
    return %c0_i32 : i32
  }
  func.func @transform_3(%arg0: i32, %arg1: i32) -> (i32, i32) {
    %c0_i32 = arith.constant 0 : i32
    %c0_i32_0 = arith.constant 0 : i32
    return %c0_i32, %arg0 : i32, i32
  }
}

</mosaic_0001>

<bundles_post_ra>
// kernel: tpu_custom_call.1
= control target key start
LH: loop header
LB: loop body
LE: loop exit
PB: predicated region body
PF: predicated region fallthrough
CT: control target
= control target key end

     0   :  { %9 = vsyncpa [#allocation4], 0  ;;  %s290_s0 = inlined_call_operand.hbm [shape: f32[8,32], index: 0, kind: input, shape index: {}]   ;;  %s291_s1 = inlined_call_operand.vmem [shape: f32[1,32], index: 1, kind: input, shape index: {}]   ;;  %s292_s2 = inlined_call_operand.<no memory space> [shape: f32[1], index: 2, kind: input, shape index: {}]   ;;  %s293_s3 = inlined_call_operand.hbm [shape: f32[1,8], index: 3, kind: output, shape index: {}]  }
   0x1   :  { %10 = vsyncpa [#allocation5], 0  ;;  %s238_s12 = smov [#allocation3]   ;;  %s190_s16 = scalar_lea.hbm %s290_s0, 128 }
   0x2   :  { %s17_s13 = sshll.u32 %s238_s12, 4  ;;  %p191_p0 = scmp.ne.s32.totalorder %s290_s0, %s190_s16  ;;  %s18_s13 = int_to_ptr.vmem [resolvable:$true] %s17_s13 }
   0x3   :  { %p194_p1 = scmp.lt.u32.totalorder %s190_s16, %s290_s0 }
   0x5   :  { %p196_p2 = pnand %p194_p1, %p191_p0 }
   0x7   :  { %199 = shalt.err (!%p196_p2)
}
   0x8   :  { %s200_s21 = scalar_lea.vmem %s18_s13, 128  ;;  %p205_p4 = scmp.lt.s32.totalorder %s18_s13, %s18_s13 }
   0x9   :  { %p201_p3 = scmp.ne.s32.totalorder %s18_s13, %s200_s21  ;;  %p206_p5 = scmp.lt.s32.totalorder %s200_s21, %s200_s21 }
   0xb   :  { %p207_p6 = por %p206_p5, %p205_p4 }
   0xd   :  { %p208_p7 = pnand %p207_p6, %p201_p3 }
   0xf   :  { %211 = shalt.err (!%p208_p7)
}
  0x10   :  { %20 = dma.hbm_to_vmem [thread:$0]  %s290_s0, 128, %s18_s13, [#allocation4]  }
  0x11   :  { %234 = dma.done.wait [#allocation4], 128  }
  0x12   :  { %235 = vsyncadd [#allocation4], 4294967168  ;;  %v28_v0 = vld [vmem:[#allocation3] sm:$0xff]  ;;  %vm37_vm0 = vcmask 261120   ;;  %v49_v4 = vlaneseq  ;;  %v46_v7 = vstv %s292_s2  ;;  %s239_s0 = smov [#allocation6]   ;;  %vm56_vm1 = vcmask 57344  }
  0x13   :  { %v187_v1 = vld [vmem:[%s291_s1] ss:$0 sm:$0xff]  ;;  %s178_s28 = sshll.u32 %s239_s0, 4  ;;  %s179_s28 = int_to_ptr.vmem [resolvable:$true] %s178_s28 }
  0x14   :  { %v36_v2 = vmul.f32 %v187_v1, %v28_v0  ;;  %v50_v5 = vand.u32 127, %v49_v4  ;;  %v52_v6 = vshrl.u32 %v49_v4, 7  ;;  %s212_s1 = scalar_lea.vmem %s179_s28, 16  ;;  %s216_s29 = scalar_lea.vmem %s179_s28, 32 }
  0x15   :  { %p213_p8 = scmp.ne.s32.totalorder %s179_s28, %s212_s1  ;;  %p217_p9 = scmp.lt.s32.totalorder %s179_s28, %s179_s28 }
  0x16   :  { %v38_v3 = vsel %vm37_vm0, %v36_v2, 0.0  ;;  %v53_v8 = vsub.s32 %v50_v5, %v52_v6  ;;  %p218_p10 = scmp.lt.s32.totalorder %s216_s29, %s212_s1 }
  0x17   :  { %39 = vadd.xlane.f32.xlu0 %v38_v3 }
  0x18   :  { %p219_p11 = por %p218_p10, %p217_p9 }
  0x1a   :  { %p220_p12 = pnand %p219_p11, %p213_p8 }
  0xa4   :  { %v40_v9 = vpop.xlane.xlu0 %39 }
  0xa5   :  { %v47_v10 = vadd.f32 %v46_v7, %v40_v9 }
  0xa7   :  { %v54_v11 = vrot.slane %v47_v10, %v53_v8 }
  0xa9   :  { %57 = vst.msk [vmem:[#allocation6] sm:$0x1] %vm56_vm1, %v54_v11 }
  0xaa   :  { %223 = shalt.err (!%p220_p12)
}
  0xab   :  { %s224_s2 = scalar_lea.hbm %s293_s3, 16 }
  0xac   :  { %p225_p13 = scmp.ne.s32.totalorder %s293_s3, %s224_s2  ;;  %p228_p0 = scmp.lt.u32.totalorder %s224_s2, %s293_s3 }
  0xae   :  { %p230_p1 = pnand %p228_p0, %p225_p13 }
  0xb0   :  { %233 = shalt.err (!%p230_p1)
}
  0xb1   :  { %181 = dma.vmem_to_hbm [thread:$0]  %s179_s28, 16, %s293_s3, [#allocation5]  }
  0xb2   :  { %236 = dma.done.wait [#allocation5], 16  }
  0xb3   :  { %237 = vsyncadd [#allocation5], 4294967280 }
  0xb4   :  { %185 = vsyncpa [#allocation4], 1 }
  0xb5   :  { %186 = vsyncpa [#allocation5], 1 }

</bundles_post_ra>
